<compile_context>
chip_gen: v6e
topology: v6e:2x2x1
jax: 0.10.0
libtpu: 0.0.40
codegen_flags: <defaults>
</compile_context>

<pallas_src>
import numpy as np
import jax
import jax.numpy as jnp
from jax import lax
from jax.experimental import pallas as pl
from jax.experimental.pallas import tpu as pltpu


# --------------------------- VMEM budgeting ---------------------------------

def _vmem_budget_bytes():
    """Scoped-VMEM budget derived from the actual device (v7x has 64 MiB/TC,
    v5e/v6e have 128 MiB); conservative default if the query is unavailable."""
    try:
        cap = int(getattr(pltpu.get_tpu_info(), "vmem_capacity_bytes", 64 << 20))
    except Exception:
        cap = 64 << 20
    return max(min(cap - (8 << 20), 96 << 20), 24 << 20)


def _tile_candidates(n, target, mults=(16, 8)):
    """Divisors of n <= target, preferring bf16-friendly multiples of 16 (then
    8), largest first.  Falls back to the full extent (always layout-legal)."""
    top = min(target, n)
    for m in mults:
        cands = [d for d in range(top, 0, -1) if n % d == 0 and d % m == 0]
        if cands:
            return cands
    return [n]


def _linear_vmem_bytes(tm, K, out_widths, in_itemsize, out_itemsize=None):
    out_itemsize = in_itemsize if out_itemsize is None else out_itemsize
    w = K * sum(out_widths) * in_itemsize          # resident weights
    x = tm * K * in_itemsize                       # activation tile
    o = tm * sum(out_widths) * out_itemsize        # output tiles
    b = sum(out_widths) * 4                        # f32 biases
    return 2 * (w + x + o + b) + (2 << 20)         # double-buffered + headroom


def _pick_linear_tile(M, K, out_widths, in_itemsize, out_itemsize, budget,
                      target=1024):
    cands = _tile_candidates(M, target)
    for tm in cands:
        if _linear_vmem_bytes(tm, K, out_widths, in_itemsize, out_itemsize) <= budget:
            return tm
    return cands[-1]


# --------------------- stage 1: fused QKV projection ------------------------

def _qkv_proj_kernel(x_ref, wq_ref, wk_ref, wv_ref, bq_ref, bv_ref,
                     q_ref, k_ref, v_ref):
    x = x_ref[...]
    q_ref[...] = (jnp.dot(x, wq_ref[...], preferred_element_type=jnp.float32)
                  + bq_ref[...]).astype(q_ref.dtype)
    # k has no bias in the reference module (zeros)
    k_ref[...] = jnp.dot(x, wk_ref[...],
                         preferred_element_type=jnp.float32).astype(k_ref.dtype)
    v_ref[...] = (jnp.dot(x, wv_ref[...], preferred_element_type=jnp.float32)
                  + bv_ref[...]).astype(v_ref.dtype)


def _qkv_projection(x2d, wq_t, wk_t, wv_t, bq, bv, out_dtype, budget):
    M, K = x2d.shape
    ahd = wq_t.shape[1]
    in_it = np.dtype(x2d.dtype).itemsize
    out_it = np.dtype(out_dtype).itemsize
    tm = _pick_linear_tile(M, K, [ahd] * 3, in_it, out_it, budget)
    need = _linear_vmem_bytes(tm, K, [ahd] * 3, in_it, out_it)

    row_spec = pl.BlockSpec((tm, K), lambda i: (i, 0))
    w_spec = pl.BlockSpec((K, ahd), lambda i: (0, 0))    # weight-stationary
    b_spec = pl.BlockSpec((1, ahd), lambda i: (0, 0))
    out_spec = pl.BlockSpec((tm, ahd), lambda i: (i, 0))
    out_sd = jax.ShapeDtypeStruct((M, ahd), out_dtype)

    return pl.pallas_call(
        _qkv_proj_kernel,
        out_shape=(out_sd, out_sd, out_sd),
        grid_spec=pltpu.PrefetchScalarGridSpec(
            num_scalar_prefetch=0,
            grid=(M // tm,),
            in_specs=[row_spec, w_spec, w_spec, w_spec, b_spec, b_spec],
            out_specs=[out_spec, out_spec, out_spec],
        ),
        compiler_params=pltpu.CompilerParams(
            dimension_semantics=("parallel",),
            vmem_limit_bytes=min(max(need, 8 << 20), budget)),
    )(x2d, wq_t, wk_t, wv_t, bq, bv)


# ----------------------- stage 3: output projection -------------------------

def _linear_bias_kernel(x_ref, w_ref, b_ref, o_ref):
    o_ref[...] = (jnp.dot(x_ref[...], w_ref[...],
                          preferred_element_type=jnp.float32)
                  + b_ref[...]).astype(o_ref.dtype)


def _out_projection(x2d, w_t, b, out_dtype, budget):
    M, K = x2d.shape
    Nout = w_t.shape[1]
    in_it = np.dtype(x2d.dtype).itemsize
    out_it = np.dtype(out_dtype).itemsize
    tm = _pick_linear_tile(M, K, [Nout], in_it, out_it, budget)
    need = _linear_vmem_bytes(tm, K, [Nout], in_it, out_it)

    return pl.pallas_call(
        _linear_bias_kernel,
        out_shape=jax.ShapeDtypeStruct((M, Nout), out_dtype),
        grid_spec=pltpu.PrefetchScalarGridSpec(
            num_scalar_prefetch=0,
            grid=(M // tm,),
            in_specs=[
                pl.BlockSpec((tm, K), lambda i: (i, 0)),
                pl.BlockSpec((K, Nout), lambda i: (0, 0)),   # weight-stationary
                pl.BlockSpec((1, Nout), lambda i: (0, 0)),
            ],
            out_specs=pl.BlockSpec((tm, Nout), lambda i: (i, 0)),
        ),
        compiler_params=pltpu.CompilerParams(
            dimension_semantics=("parallel",),
            vmem_limit_bytes=min(max(need, 8 << 20), budget)),
    )(x2d, w_t, b)


# -------------------------- stage 2: attention -------------------------------

def _attn_vmem_bytes(tq, tk, hb, d, itemsize):
    slab = hb * d
    io = 2 * (tq * slab + 2 * tk * slab + tq * slab) * itemsize  # q,k,v,out x2 buffers
    scratch = (tq * slab + 2 * tq * 128) * 4                     # acc + m + l (lane padded)
    logits = 3 * tq * tk * 4                                     # s/p temporaries
    return io + scratch + logits + (2 << 20)


def _select_attn_tiling(N, H, D, itemsize, budget,
                        tq_target=256, tk_target=512, slab_cap=1024):
    # heads-per-block: smallest divisor of H making the context slab a multiple
    # of 128 lanes (dense, unmasked stores); then grow it (still lane aligned)
    # so each grid step carries more work and amortizes the per-step overhead.
    hb0 = next((c for c in range(1, H + 1) if H % c == 0 and (c * D) % 128 == 0), H)
    hb_cands = [d for d in range(H, 0, -1)
                if H % d == 0 and d % hb0 == 0 and d * D <= slab_cap] or [H]
    tq_cands = _tile_candidates(N, tq_target)
    # prefer fully-resident K/V (tk = N): single softmax pass, K/V DMA'd once
    # per (batch, head-block) and reused across every q tile.
    tk_cands = [N] + [t for t in _tile_candidates(N, tk_target) if t != N]
    for hb in hb_cands:
        for tk in tk_cands:
            for tq in tq_cands:
                if _attn_vmem_bytes(tq, tk, hb, D, itemsize) <= budget:
                    return tq, tk, hb
    return tq_cands[-1], tk_cands[-1], hb0


def _make_attention_kernel(hb, d):
    def kernel(q_ref, k_ref, v_ref, o_ref, m_sc, l_sc, acc_sc):
        ki = pl.program_id(3)

        @pl.when(ki == 0)
        def _init():
            m_sc[...] = jnp.full_like(m_sc, -jnp.inf)
            l_sc[...] = jnp.zeros_like(l_sc)
            acc_sc[...] = jnp.zeros_like(acc_sc)

        # static loop over the heads of this head block (heads sit side by side
        # along the lane dimension of the q/k/v slabs).
        for h in range(hb):
            cs = slice(h * d, (h + 1) * d)
            qh = q_ref[:, cs]                                # (tq, d) bf16, pre-scaled
            kh = k_ref[:, cs]                                # (tk, d) bf16
            vh = v_ref[:, cs]                                # (tk, d) bf16
            # q @ k.T without an explicit transpose: contract the head_dim axes.
            s = lax.dot_general(qh, kh, (((1,), (1,)), ((), ())),
                                preferred_element_type=jnp.float32)   # (tq, tk)
            m_prev = m_sc[:, h:h + 1]
            m_new = jnp.maximum(m_prev, s.max(axis=-1, keepdims=True))
            alpha = jnp.exp(m_prev - m_new)
            p = jnp.exp(s - m_new)
            l_sc[:, h:h + 1] = alpha * l_sc[:, h:h + 1] + p.sum(axis=-1, keepdims=True)
            acc_sc[:, cs] = alpha * acc_sc[:, cs] + jnp.dot(
                p.astype(vh.dtype), vh, preferred_element_type=jnp.float32)
            m_sc[:, h:h + 1] = m_new

        @pl.when(ki == pl.num_programs(3) - 1)
        def _finalize():
            for h in range(hb):
                cs = slice(h * d, (h + 1) * d)
                l = l_sc[:, h:h + 1]
                inv = pl.reciprocal(l, approx=True)          # EUP
                inv = inv * (2.0 - l * inv)                  # one Newton step
                acc_sc[:, cs] = acc_sc[:, cs] * inv
            # single lane-dense store of the whole multi-head context slab.
            o_ref[...] = acc_sc[...].astype(o_ref.dtype)

    return kernel


def _attention(q, k, v, B, N, H, D, budget):
    """q, k, v: (B*N, H*D) head-concat layout (q already scaled)."""
    M, ahd = q.shape
    itemsize = np.dtype(q.dtype).itemsize
    tq, tk, hb = _select_attn_tiling(N, H, D, itemsize, budget)
    slab = hb * D
    nq, nk, nhb = N // tq, N // tk, H // hb
    need = _attn_vmem_bytes(tq, tk, hb, D, itemsize)

    return pl.pallas_call(
        _make_attention_kernel(hb, D),
        out_shape=jax.ShapeDtypeStruct((M, ahd), q.dtype),
        grid_spec=pltpu.PrefetchScalarGridSpec(
            num_scalar_prefetch=0,
            grid=(B, nhb, nq, nk),
            in_specs=[
                pl.BlockSpec((tq, slab), lambda b, h, i, j: (b * nq + i, h)),
                pl.BlockSpec((tk, slab), lambda b, h, i, j: (b * nk + j, h)),
                pl.BlockSpec((tk, slab), lambda b, h, i, j: (b * nk + j, h)),
            ],
            out_specs=pl.BlockSpec((tq, slab), lambda b, h, i, j: (b * nq + i, h)),
            scratch_shapes=[
                pltpu.VMEM((tq, hb), jnp.float32),     # running max (per head)
                pltpu.VMEM((tq, hb), jnp.float32),     # running denom (per head)
                pltpu.VMEM((tq, slab), jnp.float32),   # f32 context accumulator
            ],
        ),
        compiler_params=pltpu.CompilerParams(
            dimension_semantics=("parallel", "parallel", "parallel", "arbitrary"),
            vmem_limit_bytes=min(max(need, 8 << 20), budget)),
    )(q, k, v)


# ------------------------------- forward ------------------------------------

def prepare_attention_params(w_qkv, q_bias, v_bias, w_proj, b_proj,
                             num_heads, head_dim, scale, mxu_dtype=jnp.bfloat16):
    """One-time weight prep, hoisted out of the forward path (perf review):
    split the fused QKV weight, fold the attention scale into the q weight and
    bias, pre-transpose to (in, out) layout, cast to the MXU operand dtype."""
    ahd = num_heads * head_dim
    w_q, w_k, w_v = w_qkv[:ahd], w_qkv[ahd:2 * ahd], w_qkv[2 * ahd:]
    return {
        "wq_t": (w_q * scale).T.astype(mxu_dtype),            # (C, ahd)
        "wk_t": w_k.T.astype(mxu_dtype),                      # (C, ahd)
        "wv_t": w_v.T.astype(mxu_dtype),                      # (C, ahd)
        "bq": (q_bias * scale).astype(jnp.float32)[None, :],  # (1, ahd)
        "bv": v_bias.astype(jnp.float32)[None, :],            # (1, ahd)
        "wp_t": w_proj.T.astype(mxu_dtype),                   # (ahd, C)
        "bp": b_proj.astype(jnp.float32)[None, :],            # (1, C)
    }


def attention_forward(x, params, num_heads, head_dim, *, mxu_dtype=jnp.bfloat16):
    B, N, C = x.shape
    M = B * N
    budget = _vmem_budget_bytes()

    x2d = x.reshape(M, C).astype(mxu_dtype)

    # stage 1: fused QKV projection -> q, k, v in (B*N, H*D) head-concat layout
    q, k, v = _qkv_projection(x2d, params["wq_t"], params["wk_t"], params["wv_t"],
                              params["bq"], params["bv"], mxu_dtype, budget)

    # stage 2: multi-head attention directly on that layout; BlockSpec index
    # maps pick (batch rows, head columns) -- no XLA transposes between stages.
    ctx = _attention(q, k, v, B, N, num_heads, head_dim, budget)

    # stage 3: output projection (ctx already in the layout proj expects).
    out = _out_projection(ctx, params["wp_t"], params["bp"], x.dtype, budget)
    # attn_drop / proj_drop with p=0.0 are identity (eval semantics).
    return out.reshape(B, N, C)


# ------------------------------ reference -----------------------------------

def reference_attention(x, w_qkv, q_bias, v_bias, w_proj, b_proj,
                        num_heads, head_dim, scale):
    """Pure-JAX f32 reference mirroring the PyTorch forward."""
    B, N, C = x.shape
    ahd = num_heads * head_dim
    qkv_bias = jnp.concatenate([q_bias, jnp.zeros_like(v_bias), v_bias], axis=0)
    qkv = jnp.einsum('bnc,oc->bno', x, w_qkv) + qkv_bias
    qkv = qkv.reshape(B, N, 3, num_heads, head_dim).transpose(2, 0, 3, 1, 4)
    q, k, v = qkv[0], qkv[1], qkv[2]
    q = q * scale
    attn = jnp.einsum('bhqd,bhkd->bhqk', q, k)
    attn = jax.nn.softmax(attn, axis=-1)
    ctx = jnp.einsum('bhqk,bhkd->bhqd', attn, v)
    ctx = ctx.transpose(0, 2, 1, 3).reshape(B, N, ahd)
    return jnp.einsum('bna,ca->bnc', ctx, w_proj) + b_proj


if __name__ == "__main__":
    # Small shapes: dim=32, num_heads=4 -> head_dim=8, seq N=8, batch B=2
    B, N, C = 2, 8, 32
    num_heads = 4
    head_dim = C // num_heads
    ahd = head_dim * num_heads
    scale = head_dim ** (-0.5)

    key = jax.random.PRNGKey(0)
    kx, kw1, kq, kv, kw2, kb2 = jax.random.split(key, 6)

    x = jax.random.normal(kx, (B, N, C), dtype=jnp.float32)
    w_qkv = jax.random.normal(kw1, (3 * ahd, C), dtype=jnp.float32) * 0.05
    # qkv_bias=True branch: learned q_bias / v_bias, zeros for k
    q_bias = jax.random.normal(kq, (ahd,), dtype=jnp.float32) * 0.05
    v_bias = jax.random.normal(kv, (ahd,), dtype=jnp.float32) * 0.05
    w_proj = jax.random.normal(kw2, (C, ahd), dtype=jnp.float32) * 0.05
    b_proj = jax.random.normal(kb2, (C,), dtype=jnp.float32) * 0.05

    # weight prep done once, outside the forward path
    params = prepare_attention_params(w_qkv, q_bias, v_bias, w_proj, b_proj,
                                      num_heads, head_dim, scale)
    params = jax.tree_util.tree_map(jax.block_until_ready, params)

    out = attention_forward(x, params, num_heads, head_dim)
    out = jax.block_until_ready(out)

    ref = reference_attention(x, w_qkv, q_bias, v_bias, w_proj, b_proj,
                              num_heads, head_dim, scale)
    assert out.shape == (B, N, C)
    # bf16 MXU operands (f32 accumulation), scale folded into bf16 q weights,
    # approx-reciprocal + Newton normalization -> relaxed tolerance vs f32 ref.
    max_err = float(jnp.max(jnp.abs(out - ref)))
    assert jnp.allclose(out, ref, atol=2e-2, rtol=2e-2), (
        f"mismatch vs reference; max abs err {max_err}")

    print("KERNEL_OK")
</pallas_src>

<mosaic_0001>
module attributes {stable_mosaic.version = 11 : i64} {
  func.func @_qkv_proj_kernel(%arg0: i32, %arg1: memref<16x32xbf16, #tpu.memory_space<vmem>>, %arg2: memref<32x32xbf16, #tpu.memory_space<vmem>>, %arg3: memref<32x32xbf16, #tpu.memory_space<vmem>>, %arg4: memref<32x32xbf16, #tpu.memory_space<vmem>>, %arg5: memref<1x32xf32, #tpu.memory_space<vmem>>, %arg6: memref<1x32xf32, #tpu.memory_space<vmem>>, %arg7: memref<16x32xbf16, #tpu.memory_space<vmem>>, %arg8: memref<16x32xbf16, #tpu.memory_space<vmem>>, %arg9: memref<16x32xbf16, #tpu.memory_space<vmem>>) attributes {dimension_semantics = [#tpu.dimension_semantics<parallel>], iteration_bounds = array<i64: 1>, scalar_prefetch = 0 : i64, scratch_operands = 0 : i64, tpu.core_type = #tpu.core_type<tc>, window_params = [{transform_indices = @transform_0, window_bounds = array<i64: 16, 32>}, {pipeline_mode = #tpu.pipeline_mode<synchronous>, transform_indices = @transform_1, window_bounds = array<i64: 32, 32>}, {pipeline_mode = #tpu.pipeline_mode<synchronous>, transform_indices = @transform_2, window_bounds = array<i64: 32, 32>}, {pipeline_mode = #tpu.pipeline_mode<synchronous>, transform_indices = @transform_3, window_bounds = array<i64: 32, 32>}, {pipeline_mode = #tpu.pipeline_mode<synchronous>, transform_indices = @transform_4, window_bounds = array<i64: 1, 32>}, {pipeline_mode = #tpu.pipeline_mode<synchronous>, transform_indices = @transform_5, window_bounds = array<i64: 1, 32>}, {transform_indices = @transform_6, window_bounds = array<i64: 16, 32>}, {transform_indices = @transform_7, window_bounds = array<i64: 16, 32>}, {transform_indices = @transform_8, window_bounds = array<i64: 16, 32>}]} {
    %c0 = arith.constant 0 : index
    %c0_0 = arith.constant 0 : index
    %0 = vector.load %arg1[%c0, %c0_0] : memref<16x32xbf16, #tpu.memory_space<vmem>>, vector<16x32xbf16>
    %c0_1 = arith.constant 0 : index
    %c0_2 = arith.constant 0 : index
    %1 = vector.load %arg2[%c0_1, %c0_2] : memref<32x32xbf16, #tpu.memory_space<vmem>>, vector<32x32xbf16>
    %cst = arith.constant dense<0.000000e+00> : vector<16x32xf32>
    %2 = tpu.matmul %0, %1, %cst {dimension_numbers = #tpu.dot_dimension_numbers<[1], [0], [0], [1], [0, 0, 1, 1], [], []>} : vector<16x32xbf16>, vector<32x32xbf16>, vector<16x32xf32> -> vector<16x32xf32>
    %c0_3 = arith.constant 0 : index
    %c0_4 = arith.constant 0 : index
    %3 = vector.load %arg5[%c0_3, %c0_4] : memref<1x32xf32, #tpu.memory_space<vmem>>, vector<1x32xf32>
    %4 = vector.broadcast %3 : vector<1x32xf32> to vector<16x32xf32>
    %5 = arith.addf %2, %4 : vector<16x32xf32>
    %6 = arith.truncf %5 : vector<16x32xf32> to vector<16x32xbf16>
    %c0_5 = arith.constant 0 : index
    %c0_6 = arith.constant 0 : index
    %7 = vector.load %arg7[%c0_5, %c0_6] : memref<16x32xbf16, #tpu.memory_space<vmem>>, vector<16x32xbf16>
    tpu.vector_store %arg7[%c0_5, %c0_6], %6 {strides = array<i32>} : memref<16x32xbf16, #tpu.memory_space<vmem>>, vector<16x32xbf16>,
    %c0_7 = arith.constant 0 : index
    %c0_8 = arith.constant 0 : index
    %8 = vector.load %arg3[%c0_7, %c0_8] : memref<32x32xbf16, #tpu.memory_space<vmem>>, vector<32x32xbf16>
    %cst_9 = arith.constant dense<0.000000e+00> : vector<16x32xf32>
    %9 = tpu.matmul %0, %8, %cst_9 {dimension_numbers = #tpu.dot_dimension_numbers<[1], [0], [0], [1], [0, 0, 1, 1], [], []>} : vector<16x32xbf16>, vector<32x32xbf16>, vector<16x32xf32> -> vector<16x32xf32>
    %10 = arith.truncf %9 : vector<16x32xf32> to vector<16x32xbf16>
    %c0_10 = arith.constant 0 : index
    %c0_11 = arith.constant 0 : index
    %11 = vector.load %arg8[%c0_10, %c0_11] : memref<16x32xbf16, #tpu.memory_space<vmem>>, vector<16x32xbf16>
    tpu.vector_store %arg8[%c0_10, %c0_11], %10 {strides = array<i32>} : memref<16x32xbf16, #tpu.memory_space<vmem>>, vector<16x32xbf16>,
    %c0_12 = arith.constant 0 : index
    %c0_13 = arith.constant 0 : index
    %12 = vector.load %arg4[%c0_12, %c0_13] : memref<32x32xbf16, #tpu.memory_space<vmem>>, vector<32x32xbf16>
    %cst_14 = arith.constant dense<0.000000e+00> : vector<16x32xf32>
    %13 = tpu.matmul %0, %12, %cst_14 {dimension_numbers = #tpu.dot_dimension_numbers<[1], [0], [0], [1], [0, 0, 1, 1], [], []>} : vector<16x32xbf16>, vector<32x32xbf16>, vector<16x32xf32> -> vector<16x32xf32>
    %c0_15 = arith.constant 0 : index
    %c0_16 = arith.constant 0 : index
    %14 = vector.load %arg6[%c0_15, %c0_16] : memref<1x32xf32, #tpu.memory_space<vmem>>, vector<1x32xf32>
    %15 = vector.broadcast %14 : vector<1x32xf32> to vector<16x32xf32>
    %16 = arith.addf %13, %15 : vector<16x32xf32>
    %17 = arith.truncf %16 : vector<16x32xf32> to vector<16x32xbf16>
    %c0_17 = arith.constant 0 : index
    %c0_18 = arith.constant 0 : index
    %18 = vector.load %arg9[%c0_17, %c0_18] : memref<16x32xbf16, #tpu.memory_space<vmem>>, vector<16x32xbf16>
    tpu.vector_store %arg9[%c0_17, %c0_18], %17 {strides = array<i32>} : memref<16x32xbf16, #tpu.memory_space<vmem>>, vector<16x32xbf16>,
    return
  }
  func.func @transform_0(%arg0: i32) -> (i32, i32) {
    %c0_i32 = arith.constant 0 : i32
    %c0_i32_0 = arith.constant 0 : i32
    return %arg0, %c0_i32 : i32, i32
  }
  func.func @transform_1(%arg0: i32) -> (i32, i32) {
    %c0_i32 = arith.constant 0 : i32
    %c0_i32_0 = arith.constant 0 : i32
    %c0_i32_1 = arith.constant 0 : i32
    return %c0_i32, %c0_i32_0 : i32, i32
  }
  func.func @transform_2(%arg0: i32) -> (i32, i32) {
    %c0_i32 = arith.constant 0 : i32
    %c0_i32_0 = arith.constant 0 : i32
    %c0_i32_1 = arith.constant 0 : i32
    return %c0_i32, %c0_i32_0 : i32, i32
  }
  func.func @transform_3(%arg0: i32) -> (i32, i32) {
    %c0_i32 = arith.constant 0 : i32
    %c0_i32_0 = arith.constant 0 : i32
    %c0_i32_1 = arith.constant 0 : i32
    return %c0_i32, %c0_i32_0 : i32, i32
  }
  func.func @transform_4(%arg0: i32) -> (i32, i32) {
    %c0_i32 = arith.constant 0 : i32
    %c0_i32_0 = arith.constant 0 : i32
    %c0_i32_1 = arith.constant 0 : i32
    return %c0_i32, %c0_i32_0 : i32, i32
  }
  func.func @transform_5(%arg0: i32) -> (i32, i32) {
    %c0_i32 = arith.constant 0 : i32
    %c0_i32_0 = arith.constant 0 : i32
    %c0_i32_1 = arith.constant 0 : i32
    return %c0_i32, %c0_i32_0 : i32, i32
  }
  func.func @transform_6(%arg0: i32) -> (i32, i32) {
    %c0_i32 = arith.constant 0 : i32
    %c0_i32_0 = arith.constant 0 : i32
    return %arg0, %c0_i32 : i32, i32
  }
  func.func @transform_7(%arg0: i32) -> (i32, i32) {
    %c0_i32 = arith.constant 0 : i32
    %c0_i32_0 = arith.constant 0 : i32
    return %arg0, %c0_i32 : i32, i32
  }
  func.func @transform_8(%arg0: i32) -> (i32, i32) {
    %c0_i32 = arith.constant 0 : i32
    %c0_i32_0 = arith.constant 0 : i32
    return %arg0, %c0_i32 : i32, i32
  }
}

</mosaic_0001>

<bundles_post_ra>
// kernel: tpu_custom_call.1
= control target key start
LH: loop header
LB: loop body
LE: loop exit
PB: predicated region body
PF: predicated region fallthrough
CT: control target
= control target key end

     0   :  { %14 = vsyncpa [#allocation3], 0  ;;  %s699_s0 = inlined_call_operand.hbm [shape: bf16[16,32], index: 0, kind: input, shape index: {}]   ;;  %s700_s1 = inlined_call_operand.hbm [shape: bf16[32,32], index: 1, kind: input, shape index: {}]   ;;  %s701_s2 = inlined_call_operand.hbm [shape: bf16[32,32], index: 2, kind: input, shape index: {}]   ;;  %s702_s3 = inlined_call_operand.hbm [shape: bf16[32,32], index: 3, kind: input, shape index: {}]   ;;  %s703_s4 = inlined_call_operand.vmem [shape: f32[1,32], index: 4, kind: input, shape index: {}]   ;;  %s704_s5 = inlined_call_operand.vmem [shape: f32[1,32], index: 5, kind: input, shape index: {}]   ;;  %s705_s6 = inlined_call_operand.hbm [shape: bf16[16,32], index: 6, kind: output, shape index: {0}]   ;;  %s706_s7 = inlined_call_operand.hbm [shape: bf16[16,32], index: 7, kind: output, shape index: {1}]   ;;  %s707_s8 = inlined_call_operand.hbm [shape: bf16[16,32], index: 8, kind: output, shape index: {2}]  }
   0x1   :  { %15 = vsyncpa [#allocation6], 0 }
   0x2   :  { %16 = vsyncpa [#allocation9], 0 }
   0x3   :  { %17 = vsyncpa [#allocation4], 0 }
   0x4   :  { %18 = vsyncpa [#allocation12], 0  ;;  %s586_s27 = smov [#allocation5]   ;;  %s587_s29 = smov [#allocation2]  }
   0x5   :  { %s36_s28 = sshll.u32 %s586_s27, 4  ;;  %s24_s30 = sshll.u32 %s587_s29, 4  ;;  %s37_s28 = int_to_ptr.vmem [resolvable:$true] %s36_s28  ;;  %s25_s30 = int_to_ptr.vmem [resolvable:$true] %s24_s30 }
   0x6   :  { %s444_s9 = scalar_lea.vmem %s37_s28, 256  ;;  %p449_p1 = scmp.lt.s32.totalorder %s37_s28, %s37_s28 }
   0x7   :  { %p445_p0 = scmp.ne.s32.totalorder %s37_s28, %s444_s9  ;;  %p450_p2 = scmp.lt.s32.totalorder %s444_s9, %s444_s9 }
   0x9   :  { %p451_p3 = por %p450_p2, %p449_p1 }
   0xb   :  { %p452_p4 = pnand %p451_p3, %p445_p0 }
   0xd   :  { %455 = shalt.err (!%p452_p4)
}
   0xe   :  { %s588_s10 = smov 64   ;;  %s589_s11 = smov 4  }
   0xf   :  { %42 = dma.hbm_to_vmem [thread:$0]  %s700_s1, 256, %s37_s28, [#allocation6], %s588_s10, %s588_s10, %s589_s11  }
  0x10   :  { %s464_s14 = scalar_lea.vmem %s25_s30, 128  ;;  %p469_p6 = scmp.lt.s32.totalorder %s25_s30, %s25_s30 }
  0x11   :  { %p465_p5 = scmp.ne.s32.totalorder %s25_s30, %s464_s14  ;;  %p470_p7 = scmp.lt.s32.totalorder %s464_s14, %s464_s14 }
  0x13   :  { %p471_p8 = por %p470_p7, %p469_p6 }
  0x15   :  { %p472_p9 = pnand %p471_p8, %p465_p5 }
  0x17   :  { %475 = shalt.err (!%p472_p9)
}
  0x18   :  { %30 = dma.hbm_to_vmem [thread:$0]  %s699_s0, 128, %s25_s30, [#allocation3], %s588_s10, %s588_s10, %s589_s11  }
  0x19   :  { %s590_s17 = smov [#allocation7]   ;;  %s591_s19 = smov [#allocation8]  }
  0x1a   :  { %s48_s18 = sshll.u32 %s590_s17, 4  ;;  %s60_s20 = sshll.u32 %s591_s19, 4  ;;  %s49_s18 = int_to_ptr.vmem [resolvable:$true] %s48_s18  ;;  %s61_s20 = int_to_ptr.vmem [resolvable:$true] %s60_s20 }
  0x1b   :  { %s484_s1 = scalar_lea.vmem %s49_s18, 256  ;;  %p489_p11 = scmp.lt.s32.totalorder %s49_s18, %s49_s18 }
  0x1c   :  { %p485_p10 = scmp.ne.s32.totalorder %s49_s18, %s484_s1  ;;  %p490_p12 = scmp.lt.s32.totalorder %s484_s1, %s484_s1 }
  0x1e   :  { %p491_p13 = por %p490_p12, %p489_p11 }
  0x20   :  { %p492_p0 = pnand %p491_p13, %p485_p10 }
  0x22   :  { %495 = shalt.err (!%p492_p0)
}
  0x23   :  { %54 = dma.hbm_to_vmem [thread:$0]  %s701_s2, 256, %s49_s18, [#allocation6], %s588_s10, %s588_s10, %s589_s11  }
  0x24   :  { %s504_s0 = scalar_lea.vmem %s61_s20, 256  ;;  %p509_p2 = scmp.lt.s32.totalorder %s61_s20, %s61_s20 }
  0x25   :  { %p505_p1 = scmp.ne.s32.totalorder %s61_s20, %s504_s0  ;;  %p510_p3 = scmp.lt.s32.totalorder %s504_s0, %s504_s0 }
  0x27   :  { %p511_p4 = por %p510_p3, %p509_p2 }
  0x29   :  { %p512_p5 = pnand %p511_p4, %p505_p1 }
  0x2b   :  { %515 = shalt.err (!%p512_p5)
}
  0x2c   :  { %66 = dma.hbm_to_vmem [thread:$0]  %s702_s3, 256, %s61_s20, [#allocation9], %s588_s10, %s588_s10, %s589_s11  }
  0x2d   :  { %576 = dma.done.wait [#allocation3], 128  }
  0x2e   :  { %577 = vsyncadd [#allocation3], 4294967168 }
  0x2f   :  { %578 = dma.done.wait [#allocation6], 512  }
  0x30   :  { %579 = vsyncadd [#allocation6], 4294966784 }
  0x31   :  { %580 = dma.done.wait [#allocation9], 256  }
  0x32   :  { %581 = vsyncadd [#allocation9], 4294967040  ;;  %v592_v0 = vmov 0.0   ;;  %vm593_vm0 = vmmov 0   ;;  %v429_v1 = vld [vmem:[#allocation5 + $0x8] sm:$0xff]   ;;  %v430_v2 = vld [vmem:[#allocation5] sm:$0xff]  }
  0x33   :  { %394 = vmatprep.subr.bf16.mxu0 %v592_v0  ;;  %402 = vmatprep.subr.bf16.mxu1 %v592_v0  ;;  %v431_v3 = vld [vmem:[#allocation7 + $0x8] sm:$0xff]   ;;  %v433_v4 = vld [vmem:[#allocation7] sm:$0xff]   ;;  %vm114_vm1 = vcmask 261120   ;;  %v434_v6 = vld [vmem:[#allocation8 + $0x8] sm:$0xff]   ;;  %vm167_vm2 = vcmask 257024   ;;  %s594_s25 = smov [#allocation11]  }
  0x34   :  { %398 = vmatprep.mubr.msk.bf16.mxu0 %vm593_vm0, %v592_v0  ;;  %406 = vmatprep.mubr.msk.bf16.mxu1 %vm593_vm0, %v592_v0  ;;  %v432_v5 = vld [vmem:[#allocation2] sm:$0xff]   ;;  %v435_v7 = vld [vmem:[#allocation8] sm:$0xff]   ;;  %s328_s26 = sshll.u32 %s594_s25, 4  ;;  %s595_s27 = smov [#allocation10]   ;;  %s329_s26 = int_to_ptr.vmem [resolvable:$true] %s328_s26 }
  0x35   :  { %395 = vmatpush3.bf16.msra.mxu0 %v429_v1  ;;  %403 = vmatpush3.bf16.msra.mxu1 %v431_v3  ;;  %v361_v8 = vld [vmem:[%s703_s4] ss:$0 sm:$0xff]  ;;  %s316_s28 = sshll.u32 %s595_s27, 4  ;;  %s516_s30 = scalar_lea.vmem %s329_s26, 128  ;;  %s317_s28 = int_to_ptr.vmem [resolvable:$true] %s316_s28 }
  0x36   :  { %396 = vmatprep.subr.bf16.mxu0 %v592_v0  ;;  %404 = vmatprep.subr.bf16.mxu1 %v592_v0  ;;  %v373_v20 = vld [vmem:[%s704_s5] ss:$0 sm:$0xff]  ;;  %p517_p6 = scmp.ne.s32.totalorder %s329_s26, %s516_s30  ;;  %p521_p7 = scmp.lt.s32.totalorder %s329_s26, %s329_s26 }
  0x37   :  { %p522_p8 = scmp.lt.s32.totalorder %s516_s30, %s516_s30 }
  0x39   :  { %397 = vmatpush3.bf16.msra.mxu0 %v430_v2  ;;  %405 = vmatpush3.bf16.msra.mxu1 %v433_v4  ;;  %p523_p9 = por %p522_p8, %p521_p7 }
  0x3a   :  { %410 = vmatprep.subr.bf16.mxu0 %v592_v0 }
  0x3b   :  { %p524_p10 = pnand %p523_p9, %p517_p6 }
  0x3c   :  { %399 = vmatmul.mubr.msk.bf16.vlgmr.msra.gmra.mxu0 %vm114_vm1, %v432_v5  ;;  %407 = vmatmul.mubr.msk.bf16.vlgmr.msra.gmra.mxu1 %vm114_vm1, %v432_v5 }
  0x3d   :  { %411 = vmatpush3.bf16.msra.mxu0 %v434_v6  ;;  %414 = vmatprep.mubr.msk.bf16.mxu0 %vm593_vm0, %v592_v0 }
  0x3e   :  { %412 = vmatprep.subr.bf16.mxu0 %v592_v0 }
  0x41   :  { %413 = vmatpush3.bf16.msra.mxu0 %v435_v7 }
  0x44   :  { %415 = vmatmul.mubr.msk.bf16.vlgmr.msra.gmra.mxu0 %vm114_vm1, %v432_v5 }
  0xfc   :  { %v152_v9 = vpop.f32.mrf.mxu0  ;;  %v220_v12 = vpop.f32.mrf.mxu1 }
  0xfd   :  { %v153_v10 = vadd.f32 %v361_v8, %v152_v9  ;;  %v381_v14 = vpack.c.bf16 %v220_v12, %v220_v12 }
  0xfe   :  { %v400_v11 = vpop.f32.mrf.mxu0  ;;  %v408_v16 = vpop.f32.mrf.mxu1 }
  0xff   :  { %v379_v13 = vpack.c.bf16 %v153_v10, %v153_v10  ;;  %235 = vst.msk [vmem:[#allocation11] sm:$0xf] %vm167_vm2, %v381_v14 }
 0x100   :  { %v155_v15 = vpop.f32.mrf.mxu0  ;;  %v223_v19 = vpop.f32.mrf.mxu1 }
 0x101   :  { %v156_v17 = vadd.f32 %v361_v8, %v155_v15  ;;  %168 = vst.msk [vmem:[#allocation10] sm:$0xf] %vm167_vm2, %v379_v13  ;;  %v382_v22 = vpack.c.bf16 %v223_v19, %v223_v19 }
 0x102   :  { %v401_v18 = vpop.f32.mrf.mxu0  ;;  %v409_v24 = vpop.f32.mrf.mxu1 }
 0x103   :  { %v380_v21 = vpack.c.bf16 %v156_v17, %v156_v17  ;;  %236 = vst.msk [vmem:[#allocation11 + $0x4] sm:$0xf] %vm167_vm2, %v382_v22 }
 0x104   :  { %v294_v23 = vpop.f32.mrf.mxu0 }
 0x105   :  { %v295_v25 = vadd.f32 %v373_v20, %v294_v23  ;;  %169 = vst.msk [vmem:[#allocation10 + $0x4] sm:$0xf] %vm167_vm2, %v380_v21 }
 0x106   :  { %v416_v26 = vpop.f32.mrf.mxu0 }
 0x107   :  { %527 = shalt.err (!%p524_p10)
}
 0x108   :  { %334 = dma.vmem_to_hbm [thread:$0]  %s329_s26, 128, %s706_s7, [#allocation12], %s588_s10, %s588_s10, %s589_s11   ;;  %v383_v27 = vpack.c.bf16 %v295_v25, %v295_v25 }
 0x109   :  { %s536_s12 = scalar_lea.vmem %s317_s28, 128  ;;  %p541_p12 = scmp.lt.s32.totalorder %s317_s28, %s317_s28 }
 0x10a   :  { %p537_p11 = scmp.ne.s32.totalorder %s317_s28, %s536_s12  ;;  %p542_p13 = scmp.lt.s32.totalorder %s536_s12, %s536_s12 }
 0x10c   :  { %p543_p0 = por %p542_p13, %p541_p12 }
 0x10e   :  { %p544_p1 = pnand %p543_p0, %p537_p11 }
 0x110   :  { %547 = shalt.err (!%p544_p1)
}
 0x111   :  { %322 = dma.vmem_to_hbm [thread:$0]  %s317_s28, 128, %s705_s6, [#allocation4], %s588_s10, %s588_s10, %s589_s11   ;;  %v297_v28 = vpop.f32.mrf.mxu0  ;;  %309 = vst.msk [vmem:[#allocation13] sm:$0xf] %vm167_vm2, %v383_v27 }
 0x112   :  { %s596_s15 = smov [#allocation13]   ;;  %v298_v29 = vadd.f32 %v373_v20, %v297_v28 }
 0x113   :  { %s340_s16 = sshll.u32 %s596_s15, 4  ;;  %v417_v30 = vpop.f32.mrf.mxu0  ;;  %s341_s16 = int_to_ptr.vmem [resolvable:$true] %s340_s16 }
 0x114   :  { %v384_v31 = vpack.c.bf16 %v298_v29, %v298_v29  ;;  %s556_s7 = scalar_lea.vmem %s341_s16, 128  ;;  %p561_p3 = scmp.lt.s32.totalorder %s341_s16, %s341_s16 }
 0x115   :  { %p557_p2 = scmp.ne.s32.totalorder %s341_s16, %s556_s7  ;;  %p562_p4 = scmp.lt.s32.totalorder %s556_s7, %s556_s7 }
 0x116   :  { %310 = vst.msk [vmem:[#allocation13 + $0x4] sm:$0xf] %vm167_vm2, %v384_v31 }
 0x117   :  { %p563_p5 = por %p562_p4, %p561_p3 }
 0x119   :  { %p564_p6 = pnand %p563_p5, %p557_p2 }
 0x11b   :  { %567 = shalt.err (!%p564_p6)
}
 0x11c   :  { %346 = dma.vmem_to_hbm [thread:$0]  %s341_s16, 128, %s707_s8, [#allocation12], %s588_s10, %s588_s10, %s589_s11  }
 0x11d   :  { %582 = dma.done.wait [#allocation4], 128  }
 0x11e   :  { %583 = vsyncadd [#allocation4], 4294967168 }
 0x11f   :  { %584 = dma.done.wait [#allocation12], 256  }
 0x120   :  { %585 = vsyncadd [#allocation12], 4294967040 }
 0x121   :  { %356 = vsyncpa [#allocation3], 1 }
 0x122   :  { %357 = vsyncpa [#allocation6], 1 }
 0x123   :  { %358 = vsyncpa [#allocation9], 1 }
 0x124   :  { %359 = vsyncpa [#allocation4], 1 }
 0x125   :  { %360 = vsyncpa [#allocation12], 1 }

</bundles_post_ra>
